<compile_context>
chip_gen: v7x
topology: tpu7x:2x2x1
jax: 0.10.0
libtpu: 0.0.40
codegen_flags: <defaults>
</compile_context>

<pallas_src>
import jax
import jax.numpy as jnp
from jax import lax
from jax.experimental import pallas as pl
from jax.experimental.pallas import tpu as pltpu

_LANES = 128
_VMEM_LIMIT_BYTES = 32 * 1024 * 1024
_DEFAULT_VMEM_BUDGET = 18 * 1024 * 1024


def _build_avg_matrix(L, kernel_size):
    """(L, L) f32 matrix with moving_mean[t, :] = sum_s A[t, s] * x[s, :].

    A[t, s] = #{ j in [t - pad, t + pad] : clamp(j, 0, L-1) == s } / kernel_size,
    exactly the edge-replicated, stride-1 AvgPool1d of the PyTorch module.
    """
    pad = (kernel_size - 1) // 2
    t = jnp.arange(L, dtype=jnp.int32)[:, None]
    s = jnp.arange(L, dtype=jnp.int32)[None, :]
    # clamp(j, 0, L-1) == s  <=>  lo_s <= j <= hi_s
    lo = jnp.where(s == 0, -pad, s)
    hi = jnp.where(s == L - 1, L - 1 + pad, s)
    cnt = jnp.maximum(jnp.minimum(hi, t + pad) - jnp.maximum(lo, t - pad) + 1, 0)
    return cnt.astype(jnp.float32) / kernel_size


def _series_decomp_kernel(a_ref, x_ref, res_ref, mean_ref):
    """One (1, L, Nt) tile: mean = A @ x (MXU), res = x - mean (VPU).

    a_ref   : (L, L)      f32 averaging matrix (same block every grid step)
    x_ref   : (1, L, Nt)  input tile (lanes = Nt, lane-dense by construction)
    res_ref : (1, L, Nt)  x - moving_mean
    mean_ref: (1, L, Nt)  moving_mean
    """
    x = x_ref[0].astype(jnp.float32)                       # (L, Nt)
    mean = jnp.dot(a_ref[...], x,
                   preferred_element_type=jnp.float32,
                   precision=lax.Precision.HIGHEST)
    mean_ref[0] = mean.astype(mean_ref.dtype)
    res_ref[0] = (x - mean).astype(res_ref.dtype)


def _pick_tile_n(N, L, itemsize, prefer_split, vmem_budget_bytes):
    """Lane-tile size: either the full N or a 128-aligned block from a VMEM budget."""
    # Per output column (lane) of length L resident in VMEM:
    #   double-buffered input          : 2 * L * itemsize
    #   double-buffered res + mean     : 4 * L * itemsize
    #   f32 temporaries (x, mean, res) : 3 * L * 4
    per_col = 6 * L * itemsize + 12 * L
    avail = max(vmem_budget_bytes - 3 * L * L * 4, per_col * _LANES)  # reserve for A
    max_n = max(_LANES, (avail // per_col) // _LANES * _LANES)
    if N <= max_n:
        if prefer_split and N >= 2 * _LANES:
            # >= 2 balanced, lane-aligned blocks so both v7x TensorCores get work.
            return _LANES * pl.cdiv(pl.cdiv(N, 2), _LANES)
        return N
    n_blocks = pl.cdiv(N, max_n)
    return _LANES * pl.cdiv(pl.cdiv(N, n_blocks), _LANES)


def series_decomp(x, kernel_size, *, block_n=None,
                  vmem_budget_bytes=_DEFAULT_VMEM_BUDGET):
    """x: (B, L, C) -> (res, moving_mean), both (B, L, C)."""
    assert kernel_size >= 1 and kernel_size % 2 == 1, (
        "DLinear series decomposition requires an odd kernel_size (the PyTorch "
        "module is only shape-consistent for odd kernel_size).")
    B, L, C = x.shape
    a_mat = _build_avg_matrix(L, kernel_size)

    # Lane-dense re-layout for small channel counts: map B*C onto the 128-wide
    # lane axis instead of just C.  Pure layout plumbing outside the kernel.
    relayout = C < _LANES and B > 1
    if relayout:
        G, N = 1, B * C
        x3 = jnp.transpose(x, (1, 0, 2)).reshape(1, L, N)
    else:
        G, N = B, C
        x3 = x

    nt = block_n if block_n is not None else _pick_tile_n(
        N, L, x.dtype.itemsize, prefer_split=(G == 1),
        vmem_budget_bytes=vmem_budget_bytes)
    grid = (G, pl.cdiv(N, nt))

    flops = 2 * G * N * L * L + G * N * L               # matmul + subtraction
    bytes_accessed = 3 * G * N * L * x.dtype.itemsize + L * L * 4

    res3, mean3 = pl.pallas_call(
        _series_decomp_kernel,
        out_shape=(jax.ShapeDtypeStruct((G, L, N), x.dtype),
                   jax.ShapeDtypeStruct((G, L, N), x.dtype)),
        grid=grid,
        in_specs=[
            pl.BlockSpec((L, L), lambda g, n: (0, 0)),        # A: never changes block
            pl.BlockSpec((1, L, nt), lambda g, n: (g, 0, n)),
        ],
        out_specs=(
            pl.BlockSpec((1, L, nt), lambda g, n: (g, 0, n)),
            pl.BlockSpec((1, L, nt), lambda g, n: (g, 0, n)),
        ),
        compiler_params=pltpu.CompilerParams(
            dimension_semantics=("parallel", "parallel"),
            vmem_limit_bytes=_VMEM_LIMIT_BYTES),
        cost_estimate=pl.CostEstimate(
            flops=flops, transcendentals=0, bytes_accessed=bytes_accessed),
    )(a_mat, x3)

    if relayout:
        res = jnp.transpose(res3.reshape(L, B, C), (1, 0, 2))
        mean = jnp.transpose(mean3.reshape(L, B, C), (1, 0, 2))
    else:
        res, mean = res3, mean3
    return res, mean


def _reference_series_decomp(x, kernel_size):
    """Pure-JAX reference mirroring the PyTorch module."""
    pad = (kernel_size - 1) // 2
    front = jnp.repeat(x[:, 0:1, :], pad, axis=1)
    end = jnp.repeat(x[:, -1:, :], pad, axis=1)
    xpad = jnp.concatenate([front, x, end], axis=1)
    L = x.shape[1]
    windows = jnp.stack([xpad[:, i:i + L, :] for i in range(kernel_size)], axis=0)
    mean = jnp.mean(windows, axis=0)
    return x - mean, mean


if __name__ == "__main__":
    keys = jax.random.split(jax.random.PRNGKey(0), 4)
    cases = [
        ((2, 16, 8), 5),      # tiny DLinear-style shape, lane-dense relayout path
        ((4, 24, 8), 25),     # kernel_size > L: heavy edge replication
        ((3, 16, 256), 7),    # C >= 128: native layout, grid parallel over batch
        ((40, 24, 8), 9),     # relayout path with a ragged 128-aligned lane tile
    ]
    for key, ((B, L, C), k) in zip(keys, cases):
        x = jax.random.normal(key, (B, L, C), dtype=jnp.float32)
        res, mean = series_decomp(x, k)
        jax.block_until_ready((res, mean))
        res_ref, mean_ref = _reference_series_decomp(x, k)
        assert jnp.allclose(mean, mean_ref, atol=1e-4, rtol=1e-4), (B, L, C, k)
        assert jnp.allclose(res, res_ref, atol=1e-4, rtol=1e-4), (B, L, C, k)
    print("KERNEL_OK")
</pallas_src>

<mosaic_0001>
module attributes {stable_mosaic.version = 11 : i64} {
  func.func @_series_decomp_kernel(%arg0: i32, %arg1: i32, %arg2: memref<16x16xf32, #tpu.memory_space<vmem>>, %arg3: memref<1x16x16xf32, #tpu.memory_space<vmem>>, %arg4: memref<1x16x16xf32, #tpu.memory_space<vmem>>, %arg5: memref<1x16x16xf32, #tpu.memory_space<vmem>>) attributes {dimension_semantics = [#tpu.dimension_semantics<parallel>, #tpu.dimension_semantics<parallel>], iteration_bounds = array<i64: 1, 1>, scalar_prefetch = 0 : i64, scratch_operands = 0 : i64, tpu.core_type = #tpu.core_type<tc>, window_params = [{pipeline_mode = #tpu.pipeline_mode<synchronous>, transform_indices = @transform_0, window_bounds = array<i64: 16, 16>}, {transform_indices = @transform_1, window_bounds = array<i64: 1, 16, 16>}, {transform_indices = @transform_2, window_bounds = array<i64: 1, 16, 16>}, {transform_indices = @transform_3, window_bounds = array<i64: 1, 16, 16>}]} {
    %c0 = arith.constant 0 : index
    %c0_0 = arith.constant 0 : index
    %c0_1 = arith.constant 0 : index
    %0 = vector.load %arg3[%c0, %c0_0, %c0_1] : memref<1x16x16xf32, #tpu.memory_space<vmem>>, vector<1x16x16xf32>
    %1 = vector.shape_cast %0 : vector<1x16x16xf32> to vector<16x16xf32>
    %c0_2 = arith.constant 0 : index
    %c0_3 = arith.constant 0 : index
    %2 = vector.load %arg2[%c0_2, %c0_3] : memref<16x16xf32, #tpu.memory_space<vmem>>, vector<16x16xf32>
    %cst = arith.constant dense<0.000000e+00> : vector<16x16xf32>
    %3 = tpu.matmul %2, %1, %cst {dimension_numbers = #tpu.dot_dimension_numbers<[1], [0], [0], [1], [0, 0, 1, 1], [], []>, precision = #tpu.contract_precision<fp32>} : vector<16x16xf32>, vector<16x16xf32>, vector<16x16xf32> -> vector<16x16xf32>
    %c0_4 = arith.constant 0 : index
    %c0_5 = arith.constant 0 : index
    %c0_6 = arith.constant 0 : index
    %4 = vector.load %arg5[%c0_4, %c0_5, %c0_6] : memref<1x16x16xf32, #tpu.memory_space<vmem>>, vector<1x16x16xf32>
    %5 = vector.shape_cast %4 : vector<1x16x16xf32> to vector<16x16xf32>
    %6 = vector.shape_cast %3 : vector<16x16xf32> to vector<1x16x16xf32>
    tpu.vector_store %arg5[%c0_4, %c0_5, %c0_6], %6 {strides = array<i32>} : memref<1x16x16xf32, #tpu.memory_space<vmem>>, vector<1x16x16xf32>,
    %7 = arith.subf %1, %3 : vector<16x16xf32>
    %c0_7 = arith.constant 0 : index
    %c0_8 = arith.constant 0 : index
    %c0_9 = arith.constant 0 : index
    %8 = vector.load %arg4[%c0_7, %c0_8, %c0_9] : memref<1x16x16xf32, #tpu.memory_space<vmem>>, vector<1x16x16xf32>
    %9 = vector.shape_cast %8 : vector<1x16x16xf32> to vector<16x16xf32>
    %10 = vector.shape_cast %7 : vector<16x16xf32> to vector<1x16x16xf32>
    tpu.vector_store %arg4[%c0_7, %c0_8, %c0_9], %10 {strides = array<i32>} : memref<1x16x16xf32, #tpu.memory_space<vmem>>, vector<1x16x16xf32>,
    return
  }
  func.func @transform_0(%arg0: i32, %arg1: i32) -> (i32, i32) {
    %c0_i32 = arith.constant 0 : i32
    %c0_i32_0 = arith.constant 0 : i32
    %c0_i32_1 = arith.constant 0 : i32
    return %c0_i32, %c0_i32_0 : i32, i32
  }
  func.func @transform_1(%arg0: i32, %arg1: i32) -> (i32, i32, i32) {
    %c0_i32 = arith.constant 0 : i32
    %c0_i32_0 = arith.constant 0 : i32
    return %arg0, %c0_i32, %arg1 : i32, i32, i32
  }
  func.func @transform_2(%arg0: i32, %arg1: i32) -> (i32, i32, i32) {
    %c0_i32 = arith.constant 0 : i32
    %c0_i32_0 = arith.constant 0 : i32
    return %arg0, %c0_i32, %arg1 : i32, i32, i32
  }
  func.func @transform_3(%arg0: i32, %arg1: i32) -> (i32, i32, i32) {
    %c0_i32 = arith.constant 0 : i32
    %c0_i32_0 = arith.constant 0 : i32
    return %arg0, %c0_i32, %arg1 : i32, i32, i32
  }
}

</mosaic_0001>

<bundles_post_ra>
// kernel: tpu_custom_call.1
= control target key start
LH: loop header
LB: loop body
LE: loop exit
PB: predicated region body
PF: predicated region fallthrough
CT: control target
= control target key end

     0   :  { %9 = vsyncpa [#allocation3], 0  ;;  %s907_s0 = inlined_call_operand.hbm [shape: f32[16,16], index: 0, kind: input, shape index: {}]   ;;  %s908_s1 = inlined_call_operand.hbm [shape: f32[1,16,16], index: 1, kind: input, shape index: {}]   ;;  %s909_s2 = inlined_call_operand.hbm [shape: f32[1,16,16], index: 2, kind: output, shape index: {0}]   ;;  %s910_s3 = inlined_call_operand.hbm [shape: f32[1,16,16], index: 3, kind: output, shape index: {1}]  }
   0x1   :  { %10 = vsyncpa [#allocation6], 0 }
   0x2   :  { %11 = vsyncpa [#allocation4], 0 }
   0x3   :  { %12 = vsyncpa [#allocation9], 0  ;;  %s798_s12 = smov [#allocation2]   ;;  %s702_s16 = scalar_lea.hbm %s907_s0, 256 }
   0x4   :  { %s18_s13 = sshll.u32 %s798_s12, 4  ;;  %p703_p0 = scmp.ne.s32.totalorder %s907_s0, %s702_s16  ;;  %s19_s13 = int_to_ptr.vmem [resolvable:$true] %s18_s13 }
   0x5   :  { %p706_p1 = scmp.lt.u32.totalorder %s702_s16, %s907_s0 }
   0x7   :  { %p708_p2 = pnand %p706_p1, %p703_p0 }
   0x9   :  { %711 = shalt.err (!%p708_p2)
}
   0xa   :  { %s712_s21 = scalar_lea.vmem %s19_s13, 256  ;;  %p717_p4 = scmp.lt.s32.totalorder %s19_s13, %s19_s13 }
   0xb   :  { %p713_p3 = scmp.ne.s32.totalorder %s19_s13, %s712_s21  ;;  %p718_p5 = scmp.lt.s32.totalorder %s712_s21, %s712_s21 }
   0xd   :  { %p719_p6 = por %p718_p5, %p717_p4 }
   0xf   :  { %p720_p7 = pnand %p719_p6, %p713_p3 }
  0x11   :  { %723 = shalt.err (!%p720_p7)
}
  0x12   :  { %s799_s22 = smov 128   ;;  %s800_s23 = smov 8  }
  0x13   :  { %24 = dma.hbm_to_vmem [thread:$0]  %s907_s0, 256, %s19_s13, [#allocation3], %s799_s22, %s799_s22, %s800_s23  }
  0x14   :  { %s801_s26 = smov [#allocation5]   ;;  %s724_s30 = scalar_lea.hbm %s908_s1, 256 }
  0x15   :  { %s30_s27 = sshll.u32 %s801_s26, 4  ;;  %p725_p8 = scmp.ne.s32.totalorder %s908_s1, %s724_s30  ;;  %s31_s27 = int_to_ptr.vmem [resolvable:$true] %s30_s27 }
  0x16   :  { %p728_p9 = scmp.lt.u32.totalorder %s724_s30, %s908_s1 }
  0x18   :  { %p730_p10 = pnand %p728_p9, %p725_p8 }
  0x1a   :  { %733 = shalt.err (!%p730_p10)
}
  0x1b   :  { %s734_s8 = scalar_lea.vmem %s31_s27, 256  ;;  %p739_p12 = scmp.lt.s32.totalorder %s31_s27, %s31_s27 }
  0x1c   :  { %p735_p11 = scmp.ne.s32.totalorder %s31_s27, %s734_s8  ;;  %p740_p13 = scmp.lt.s32.totalorder %s734_s8, %s734_s8 }
  0x1e   :  { %p741_p0 = por %p740_p13, %p739_p12 }
  0x20   :  { %p742_p1 = pnand %p741_p0, %p735_p11 }
  0x22   :  { %745 = shalt.err (!%p742_p1)
}
  0x23   :  { %36 = dma.hbm_to_vmem [thread:$0]  %s908_s1, 256, %s31_s27, [#allocation6], %s799_s22, %s799_s22, %s800_s23  }
  0x24   :  { %790 = dma.done.wait [#allocation3], 256  }
  0x25   :  { %791 = vsyncadd [#allocation3], 4294967040 }
  0x26   :  { %792 = dma.done.wait [#allocation6], 256  }
  0x27   :  { %793 = vsyncadd [#allocation6], 4294967040  ;;  %vm47_vm0 = vcmask 130048   ;;  %v854_v0 = vld [vmem:[#allocation5] sm:$0xff]  ;;  %v856_v1 = vld [vmem:[#allocation5 + $0x8] sm:$0xff]  ;;  %s802_s1 = smov [#allocation8]  }
  0x28   :  { %v45_v2 = vld [vmem:[#allocation2] sm:$0xff]  ;;  %v55_v3 = vand.u32 4294901760, %v854_v0  ;;  %v58_v4 = vand.u32 4294901760, %v856_v1  ;;  %v46_v6 = vld [vmem:[#allocation2 + $0x8] sm:$0xff]  ;;  %s579_s10 = sshll.u32 %s802_s1, 4  ;;  %s803_s11 = smov [#allocation7]   ;;  %s580_s10 = int_to_ptr.vmem [resolvable:$true] %s579_s10 }
  0x29   :  { %v49_v5 = vsel %vm47_vm0, %v45_v2, 0  ;;  %v52_v8 = vsel %vm47_vm0, %v46_v6, 0  ;;  %s567_s12 = sshll.u32 %s803_s11, 4  ;;  %s746_s13 = scalar_lea.vmem %s580_s10, 256  ;;  %s868_s12 = int_to_ptr.vmem [resolvable:$true] %s567_s12 }
  0x2a   :  { %v121_v7 = vand.u32 4294901760, %v49_v5  ;;  %v662_v9 = vpack.c.bf16 %v58_v4, %v55_v3  ;;  %v131_v10 = vand.u32 4294901760, %v52_v8  ;;  %v143_v11 = vsub.f32 %v854_v0, %v55_v3  ;;  %p747_p2 = scmp.ne.s32.totalorder %s580_s10, %s746_s13  ;;  %p751_p3 = scmp.lt.s32.totalorder %s580_s10, %s580_s10 }
  0x2b   :  { %v150_v12 = vsub.f32 %v856_v1, %v58_v4  ;;  %p752_p4 = scmp.lt.s32.totalorder %s746_s13, %s746_s13 }
  0x2c   :  { %v122_v13 = vsub.f32 %v49_v5, %v121_v7  ;;  %675 = vmatprep.subr.bf16.mxu0 %v662_v9  ;;  %663 = vmatprep.subr.bf16.mxu1 %v662_v9  ;;  %v132_v14 = vsub.f32 %v52_v8, %v131_v10  ;;  %v144_v15 = vand.u32 4294901760, %v143_v11 }
  0x2d   :  { %v151_v16 = vand.u32 4294901760, %v150_v12  ;;  %677 = vmatpush3.bf16.msra.mxu0 %v662_v9  ;;  %665 = vmatpush3.bf16.msra.mxu1 %v662_v9  ;;  %v670_v29 = vpack.c.bf16 %v150_v12, %v143_v11  ;;  %p753_p5 = por %p752_p4, %p751_p3 }
  0x2e   :  { %v123_v17 = vand.u32 4294901760, %v122_v13  ;;  %v133_v18 = vand.u32 4294901760, %v132_v14  ;;  %v145_v19 = vsub.f32 %v143_v11, %v144_v15 }
  0x2f   :  { %v152_v20 = vsub.f32 %v150_v12, %v151_v16  ;;  %v678_v21 = vpack.c.bf16 %v151_v16, %v144_v15  ;;  %p754_p6 = pnand %p753_p5, %p747_p2 }
  0x30   :  { %645 = vmatprep.mubr.f32.mxu0 %v123_v17  ;;  %v124_v22 = vsub.f32 %v122_v13, %v123_v17  ;;  %v134_v23 = vsub.f32 %v132_v14, %v133_v18  ;;  %v146_v24 = vand.u32 4294901760, %v145_v19 }
  0x31   :  { %646 = vmatmul.mubr.f32.vlgmr.msra.gmra.mrb[0].mxu0 %v133_v18  ;;  %v153_v25 = vand.u32 4294901760, %v152_v20  ;;  %679 = vmatprep.subr.bf16.mxu0 %v678_v21 }
  0x32   :  { %v125_v26 = vand.u32 4294901760, %v124_v22  ;;  %681 = vmatpush3.bf16.msra.mxu0 %v678_v21  ;;  %652 = vmatprep.mubr.f32.mxu0 %v121_v7  ;;  %v135_v27 = vand.u32 4294901760, %v134_v23 }
  0x33   :  { %v666_v28 = vpack.c.bf16 %v153_v25, %v146_v24  ;;  %683 = vmatprep.subr.bf16.mxu0 %v662_v9 }
  0x34   :  { %624 = vmatprep.mubr.f32.mxu1 %v125_v26 }
  0x35   :  { %625 = vmatmul.mubr.f32.vlgmr.msra.gmra.mrb[0].mxu1 %v135_v27  ;;  %667 = vmatprep.subr.bf16.mxu1 %v666_v28 }
  0x36   :  { %669 = vmatpush3.bf16.msra.mxu1 %v666_v28  ;;  %631 = vmatprep.mubr.f32.mxu1 %v121_v7 }
  0x37   :  { %671 = vmatprep.subr.bf16.mxu1 %v670_v29 }
  0x39   :  { %653 = vmatmul.mubr.f32.vlgmr.msra.gmra.mrb[0].mxu0 %v131_v10 }
  0x3a   :  { %685 = vmatpush3.bf16.msra.mxu0 %v662_v9  ;;  %659 = vmatprep.mubr.f32.mxu0 %v121_v7 }
  0x3d   :  { %632 = vmatmul.mubr.f32.vlgmr.msra.gmra.mrb[0].mxu1 %v131_v10 }
  0x3e   :  { %673 = vmatpush3.bf16.msra.mxu1 %v670_v29  ;;  %638 = vmatprep.mubr.f32.mxu1 %v122_v13 }
  0x41   :  { %660 = vmatmul.mubr.f32.vlgmr.msra.gmra.mrb[0].mxu0 %v131_v10 }
  0x45   :  { %639 = vmatmul.mubr.f32.vlgmr.msra.gmra.mrb[0].mxu1 %v132_v14 }
 0x114   :  { %v661_v30 = vpop.f32.mrb[0].mxu0 }
 0x115   :  { %v546_v31 = vpop.f32.mrb[1].mxu0 }
 0x118   :  { %v640_v32 = vpop.f32.mrb[0].mxu1 }
 0x119   :  { %v686_v33 = vadd.f32 %v661_v30, %v640_v32  ;;  %v300_v34 = vpop.f32.mrb[1].mxu1 }
 0x11a   :  { %v687_v35 = vadd.f32 %v546_v31, %v300_v34 }
 0x11b   :  { %v559_v36 = vsub.f32 %v856_v1, %v686_v33  ;;  %557 = vst.msk [vmem:[#allocation8 + $0x8] sm:$0xff] %vm47_vm0, %v686_v33 }
 0x11c   :  { %v558_v37 = vsub.f32 %v854_v0, %v687_v35  ;;  %556 = vst.msk [vmem:[#allocation8] sm:$0xff] %vm47_vm0, %v687_v35 }
 0x11d   :  { %561 = vst.msk [vmem:[#allocation7 + $0x8] sm:$0xff] %vm47_vm0, %v559_v36 }
 0x11e   :  { %757 = shalt.err (!%p754_p6)
}
 0x11f   :  { %s758_s16 = scalar_lea.hbm %s910_s3, 256 }
 0x120   :  { %p759_p7 = scmp.ne.s32.totalorder %s910_s3, %s758_s16  ;;  %p762_p8 = scmp.lt.u32.totalorder %s758_s16, %s910_s3 }
 0x122   :  { %p764_p9 = pnand %p762_p8, %p759_p7 }
 0x124   :  { %767 = shalt.err (!%p764_p9)
}
 0x125   :  { %585 = dma.vmem_to_hbm [thread:$0]  %s580_s10, 256, %s910_s3, [#allocation9], %s799_s22, %s799_s22, %s800_s23   ;;  %560 = vst.msk [vmem:[#allocation7] sm:$0xff] %vm47_vm0, %v558_v37 }
 0x126   :  { %s768_s25 = scalar_lea.vmem %s868_s12, 256  ;;  %p773_p11 = scmp.lt.s32.totalorder %s868_s12, %s868_s12 }
 0x127   :  { %p769_p10 = scmp.ne.s32.totalorder %s868_s12, %s768_s25  ;;  %p774_p12 = scmp.lt.s32.totalorder %s768_s25, %s768_s25 }
 0x129   :  { %p775_p13 = por %p774_p12, %p773_p11 }
 0x12b   :  { %p776_p0 = pnand %p775_p13, %p769_p10 }
 0x12d   :  { %779 = shalt.err (!%p776_p0)
}
 0x12e   :  { %s780_s28 = scalar_lea.hbm %s909_s2, 256 }
 0x12f   :  { %p781_p1 = scmp.ne.s32.totalorder %s909_s2, %s780_s28  ;;  %p784_p2 = scmp.lt.u32.totalorder %s780_s28, %s909_s2 }
 0x131   :  { %p786_p3 = pnand %p784_p2, %p781_p1 }
 0x133   :  { %789 = shalt.err (!%p786_p3)
}
 0x134   :  { %573 = dma.vmem_to_hbm [thread:$0]  %s868_s12, 256, %s909_s2, [#allocation4], %s799_s22, %s799_s22, %s800_s23  }
 0x135   :  { %794 = dma.done.wait [#allocation4], 256  }
 0x136   :  { %795 = vsyncadd [#allocation4], 4294967040 }
 0x137   :  { %796 = dma.done.wait [#allocation9], 256  }
 0x138   :  { %797 = vsyncadd [#allocation9], 4294967040 }
 0x139   :  { %592 = vsyncpa [#allocation3], 1 }
 0x13a   :  { %593 = vsyncpa [#allocation6], 1 }
 0x13b   :  { %594 = vsyncpa [#allocation4], 1 }
 0x13c   :  { %595 = vsyncpa [#allocation9], 1 }

</bundles_post_ra>
